<compile_context>
chip_gen: v7x
topology: tpu7x:2x2x1
jax: 0.10.0
libtpu: 0.0.40
codegen_flags: <defaults>
</compile_context>

<pallas_src>
import jax
import jax.numpy as jnp
from jax import lax
from jax.experimental import pallas as pl
from jax.experimental.pallas import tpu as pltpu

SMOOTH = 1.0          # smoothing constant of the standard DiceLoss implementation
LANES = 128

_VMEM_TILE_BUDGET_BYTES = 4 * 1024 * 1024     # per-step working-set target
_VMEM_LIMIT_BYTES = 32 * 1024 * 1024          # scoped VMEM limit (safe on v5e/v6e/v7x)
_MIN_PALLAS_ELEMS = 64 * 1024                 # below this, XLA's fused reduce wins


def _cdiv(a, b):
    return -(-a // b)


def _num_tensorcores():
    """2 TensorCores per chip on v7x; 1 on v5e/v6e."""
    try:
        kind = jax.devices()[0].device_kind.lower()
    except Exception:
        return 1
    return 2 if ("v7" in kind or "7x" in kind) else 1


def _make_dice_partial_kernel(n, block_rows, steps, valid_elems, needs_mask):
    groups = block_rows // 8

    def kernel(p_ref, g_ref, inter_ref, psum_ref, gsum_ref):
        pi = pl.program_id(0)     # independent chunk ("parallel")
        j = pl.program_id(1)      # sequential reduction step ("arbitrary")

        @pl.when(j == 0)
        def _():
            inter_ref[...] = jnp.zeros_like(inter_ref)
            psum_ref[...] = jnp.zeros_like(psum_ref)
            gsum_ref[...] = jnp.zeros_like(gsum_ref)

        # Hot path: in-kernel f32 upcast of native-dtype inputs (bf16 / int8).
        x = p_ref[...].astype(jnp.float32)          # (n, R, 128)
        g = g_ref[...].astype(jnp.float32)          # 1-byte gt -> f32 in VMEM
        # sigmoid = 0.5*(tanh(x/2)+1): one EUP op + VPU mul/add (no divide).
        p = 0.5 * (jnp.tanh(0.5 * x) + 1.0)

        if needs_mask:
            # Grid coverage exceeds the true per-sample length: zero the
            # contribution of out-of-range rows/lanes of the partial block(s).
            # Selecting AFTER the sigmoid makes padding/garbage exactly 0,
            # even if the unread VMEM region held NaN/Inf bit patterns.
            row0 = (pi * steps + j) * block_rows
            ridx = lax.broadcasted_iota(jnp.int32, (1, block_rows, LANES), 1)
            lidx = lax.broadcasted_iota(jnp.int32, (1, block_rows, LANES), 2)
            eidx = (row0 + ridx) * LANES + lidx
            valid = eidx < valid_elems
            p = jnp.where(valid, p, 0.0)
            g = jnp.where(valid, g, 0.0)

        # vreg-granular partial sums: (n, R, 128) -> (n, R//8, 8, 128) keeps the
        # reduce as whole-vreg VPU adds (no per-step XLU sublane reduce).
        p4 = p.reshape(n, groups, 8, LANES)
        g4 = g.reshape(n, groups, 8, LANES)
        inter_ref[...] += jnp.sum(p4 * g4, axis=1)
        psum_ref[...] += jnp.sum(p4, axis=1)
        gsum_ref[...] += jnp.sum(g4, axis=1)

    return kernel


def _choose_block_rows(rows_arr, rows_per_chunk, per_row_bytes, requested):
    if requested is None:
        requested = max(8, _VMEM_TILE_BUDGET_BYTES // per_row_bytes)
    # Keep >= ~4 reduction steps per chunk so double-buffering has DMA to hide.
    requested = min(int(requested), _cdiv(rows_per_chunk, 4))
    if requested >= 32:
        requested = (requested // 32) * 32     # narrow-dtype (int8 gt) packing
    else:
        requested = max(8, (requested // 8) * 8)
    # Never exceed the array's row extent (floored to a multiple of 8).
    return min(requested, max(8, (rows_arr // 8) * 8))


def seg_loss(predict, gt, is_average=True, block_rows=None, use_pallas=None):
    """
    SegLoss(loss_func='dice', activation='sigmoid') forward pass.

    predict: [n, c, h, w] raw logits (any float dtype; streamed natively).
    gt:      [n, c, h, w] one-hot ground truth; pass a 1-byte dtype
             (int8/uint8/bool) to halve its HBM traffic — upcast is in-kernel.
    Returns scalar: 1 - mean_n(dice_n) (or 1 - sum_n if is_average=False).
    """
    # TODO(synk): only the default ('dice', 'sigmoid') configuration is
    # implemented; the softmax activation and the combined losses are not.
    n, c, h, w = predict.shape
    assert gt.shape == predict.shape
    L = c * h * w

    if use_pallas is None:
        use_pallas = L >= _MIN_PALLAS_ELEMS
    if (not use_pallas) or L < 8 * LANES:
        # Tiny inputs: launch + per-step overhead dominates; let XLA fuse it.
        return _seg_loss_ref(predict, gt, is_average)

    rows_arr = _cdiv(L, LANES)
    L_pad = rows_arr * LANES

    p_flat = predict.reshape(n, L)
    g_flat = gt.reshape(n, L)
    if L_pad != L:
        # Lane-tail only (< 128 elems/sample).  Padded values are masked
        # in-kernel, so a plain zero pad is fine.  Shapes with L % 128 == 0
        # (the common case) take the zero-copy path and skip this entirely.
        p_flat = jnp.pad(p_flat, ((0, 0), (0, L_pad - L)))
        g_flat = jnp.pad(g_flat, ((0, 0), (0, L_pad - L)))
    p3 = p_flat.reshape(n, rows_arr, LANES)
    g3 = g_flat.reshape(n, rows_arr, LANES)

    # Leading "parallel" chunk axis: >1 only on multi-TensorCore chips (v7x).
    n_parallel = _num_tensorcores()
    if n_parallel > 1 and rows_arr < n_parallel * 4 * 32:
        n_parallel = 1
    rows_per_chunk = _cdiv(rows_arr, n_parallel)

    per_row_bytes = n * LANES * (
        2 * (predict.dtype.itemsize + gt.dtype.itemsize)   # double-buffered inputs
        + 3 * 4                                            # f32 elementwise temps
    )
    block_rows = _choose_block_rows(rows_arr, rows_per_chunk, per_row_bytes, block_rows)
    steps = _cdiv(rows_per_chunk, block_rows)
    needs_mask = (n_parallel * steps * block_rows * LANES) != L

    kernel = _make_dice_partial_kernel(n, block_rows, steps, L, needs_mask)

    row_block = lambda pi, j: (0, pi * steps + j, 0)
    acc_block = lambda pi, j: (pi, 0, 0, 0)
    acc_sds = jax.ShapeDtypeStruct((n_parallel, n, 8, LANES), jnp.float32)

    inter_p, psum_p, gsum_p = pl.pallas_call(
        kernel,
        out_shape=(acc_sds, acc_sds, acc_sds),
        grid_spec=pltpu.PrefetchScalarGridSpec(
            num_scalar_prefetch=0,
            grid=(n_parallel, steps),
            in_specs=[
                pl.BlockSpec((n, block_rows, LANES), row_block),
                pl.BlockSpec((n, block_rows, LANES), row_block),
            ],
            out_specs=[
                pl.BlockSpec((None, n, 8, LANES), acc_block),
                pl.BlockSpec((None, n, 8, LANES), acc_block),
                pl.BlockSpec((None, n, 8, LANES), acc_block),
            ],
        ),
        compiler_params=pltpu.CompilerParams(
            # TODO(synk): on v7x, verify with xprof that the leading axis really
            # lands on both TensorCores; switch to pltpu.CORE_PARALLEL if not.
            dimension_semantics=("parallel", "arbitrary"),
            vmem_limit_bytes=_VMEM_LIMIT_BYTES,
        ),
    )(p3, g3)

    # Tiny epilogue: cross-chunk + sublane + lane reduce and the dice ratio.
    inter = jnp.sum(inter_p, axis=(0, 2, 3))    # (n,)
    psum = jnp.sum(psum_p, axis=(0, 2, 3))
    gsum = jnp.sum(gsum_p, axis=(0, 2, 3))
    dice = (2.0 * inter + SMOOTH) / (psum + gsum + SMOOTH)
    score = jnp.sum(dice) / n if is_average else jnp.sum(dice)
    return 1.0 - score


def _seg_loss_ref(predict, gt, is_average=True):
    """Pure-JAX reference matching the PyTorch DiceLoss semantics."""
    n = predict.shape[0]
    p = jax.nn.sigmoid(predict.astype(jnp.float32)).reshape(n, -1)
    g = gt.astype(jnp.float32).reshape(n, -1)
    inter = jnp.sum(p * g, axis=1)
    dice = (2.0 * inter + SMOOTH) / (jnp.sum(p, axis=1) + jnp.sum(g, axis=1) + SMOOTH)
    score = jnp.sum(dice) / n if is_average else jnp.sum(dice)
    return 1.0 - score


if __name__ == "__main__":
    key = jax.random.PRNGKey(0)
    k_pred, k_lbl = jax.random.split(key)

    N, C, H, W = 2, 4, 16, 16
    # Native bf16 logits and 1-byte (int8) one-hot gt: the kernel streams them
    # as-is and upcasts inside VMEM.
    predict = jax.random.normal(k_pred, (N, C, H, W), dtype=jnp.float32).astype(
        jnp.bfloat16
    )
    labels = jax.random.randint(k_lbl, (N, H, W), 0, C)
    gt = jax.nn.one_hot(labels, C, dtype=jnp.int8)     # [n, h, w, c]
    gt = jnp.transpose(gt, (0, 3, 1, 2))               # -> [n, c, h, w] (NCHW)

    # Force the Pallas path (the auto heuristic would use the pure-JAX
    # fallback at this small demo size).
    loss = seg_loss(predict, gt, is_average=True, use_pallas=True)
    loss = jax.block_until_ready(loss)

    ref = _seg_loss_ref(predict, gt, is_average=True)
    assert jnp.allclose(loss, ref, atol=1e-4, rtol=1e-4), (loss, ref)

    print("KERNEL_OK")
</pallas_src>

<mosaic_0001>
module attributes {stable_mosaic.version = 11 : i64} {
  func.func @kernel(%arg0: i32, %arg1: i32, %arg2: memref<2x8x128xbf16, #tpu.memory_space<vmem>>, %arg3: memref<2x8x128xi8, #tpu.memory_space<vmem>>, %arg4: memref<1x2x8x128xf32, #tpu.memory_space<vmem>>, %arg5: memref<1x2x8x128xf32, #tpu.memory_space<vmem>>, %arg6: memref<1x2x8x128xf32, #tpu.memory_space<vmem>>) attributes {dimension_semantics = [#tpu.dimension_semantics<parallel>, #tpu.dimension_semantics<arbitrary>], iteration_bounds = array<i64: 1, 1>, scalar_prefetch = 0 : i64, scratch_operands = 0 : i64, tpu.core_type = #tpu.core_type<tc>, window_params = [{transform_indices = @transform_0, window_bounds = array<i64: 2, 8, 128>}, {transform_indices = @transform_1, window_bounds = array<i64: 2, 8, 128>}, {transform_indices = @transform_2, window_bounds = array<i64: 1, 2, 8, 128>}, {transform_indices = @transform_3, window_bounds = array<i64: 1, 2, 8, 128>}, {transform_indices = @transform_4, window_bounds = array<i64: 1, 2, 8, 128>}]} {
    %c0_i32 = arith.constant 0 : i32
    %0 = arith.cmpi eq, %arg1, %c0_i32 : i32
    %1 = arith.extui %0 : i1 to i32
    %c0_i32_0 = arith.constant 0 : i32
    %2 = arith.cmpi ne, %1, %c0_i32_0 : i32
    scf.if %2 {
      %cst_35 = arith.constant 0.000000e+00 : f32
      %38 = vector.broadcast %cst_35 : f32 to vector<2x8x128xf32>
      %c0_36 = arith.constant 0 : index
      %c0_37 = arith.constant 0 : index
      %c0_38 = arith.constant 0 : index
      %c0_39 = arith.constant 0 : index
      %39 = vector.load %arg4[%c0_36, %c0_37, %c0_38, %c0_39] : memref<1x2x8x128xf32, #tpu.memory_space<vmem>>, vector<1x2x8x128xf32>
      %40 = vector.shape_cast %39 : vector<1x2x8x128xf32> to vector<2x8x128xf32>
      %41 = vector.shape_cast %38 : vector<2x8x128xf32> to vector<1x2x8x128xf32>
      tpu.vector_store %arg4[%c0_36, %c0_37, %c0_38, %c0_39], %41 {strides = array<i32>} : memref<1x2x8x128xf32, #tpu.memory_space<vmem>>, vector<1x2x8x128xf32>,
      %cst_40 = arith.constant 0.000000e+00 : f32
      %42 = vector.broadcast %cst_40 : f32 to vector<2x8x128xf32>
      %c0_41 = arith.constant 0 : index
      %c0_42 = arith.constant 0 : index
      %c0_43 = arith.constant 0 : index
      %c0_44 = arith.constant 0 : index
      %43 = vector.load %arg5[%c0_41, %c0_42, %c0_43, %c0_44] : memref<1x2x8x128xf32, #tpu.memory_space<vmem>>, vector<1x2x8x128xf32>
      %44 = vector.shape_cast %43 : vector<1x2x8x128xf32> to vector<2x8x128xf32>
      %45 = vector.shape_cast %42 : vector<2x8x128xf32> to vector<1x2x8x128xf32>
      tpu.vector_store %arg5[%c0_41, %c0_42, %c0_43, %c0_44], %45 {strides = array<i32>} : memref<1x2x8x128xf32, #tpu.memory_space<vmem>>, vector<1x2x8x128xf32>,
      %cst_45 = arith.constant 0.000000e+00 : f32
      %46 = vector.broadcast %cst_45 : f32 to vector<2x8x128xf32>
      %c0_46 = arith.constant 0 : index
      %c0_47 = arith.constant 0 : index
      %c0_48 = arith.constant 0 : index
      %c0_49 = arith.constant 0 : index
      %47 = vector.load %arg6[%c0_46, %c0_47, %c0_48, %c0_49] : memref<1x2x8x128xf32, #tpu.memory_space<vmem>>, vector<1x2x8x128xf32>
      %48 = vector.shape_cast %47 : vector<1x2x8x128xf32> to vector<2x8x128xf32>
      %49 = vector.shape_cast %46 : vector<2x8x128xf32> to vector<1x2x8x128xf32>
      tpu.vector_store %arg6[%c0_46, %c0_47, %c0_48, %c0_49], %49 {strides = array<i32>} : memref<1x2x8x128xf32, #tpu.memory_space<vmem>>, vector<1x2x8x128xf32>,
    } else {
    }
    %c0 = arith.constant 0 : index
    %c0_1 = arith.constant 0 : index
    %c0_2 = arith.constant 0 : index
    %3 = vector.load %arg2[%c0, %c0_1, %c0_2] : memref<2x8x128xbf16, #tpu.memory_space<vmem>>, vector<2x8x128xbf16>
    %4 = arith.extf %3 : vector<2x8x128xbf16> to vector<2x8x128xf32>
    %c0_3 = arith.constant 0 : index
    %c0_4 = arith.constant 0 : index
    %c0_5 = arith.constant 0 : index
    %5 = vector.load %arg3[%c0_3, %c0_4, %c0_5] : memref<2x8x128xi8, #tpu.memory_space<vmem>>, vector<2x8x128xi8>
    %6 = arith.sitofp %5 : vector<2x8x128xi8> to vector<2x8x128xf32>
    %cst = arith.constant 5.000000e-01 : f32
    %7 = vector.broadcast %cst : f32 to vector<2x8x128xf32>
    %8 = arith.mulf %7, %4 : vector<2x8x128xf32>
    %9 = math.tanh %8 : vector<2x8x128xf32>
    %cst_6 = arith.constant 1.000000e+00 : f32
    %10 = vector.broadcast %cst_6 : f32 to vector<2x8x128xf32>
    %11 = arith.addf %9, %10 : vector<2x8x128xf32>
    %cst_7 = arith.constant 5.000000e-01 : f32
    %12 = vector.broadcast %cst_7 : f32 to vector<2x8x128xf32>
    %13 = arith.mulf %12, %11 : vector<2x8x128xf32>
    %14 = vector.shape_cast %13 : vector<2x8x128xf32> to vector<2x1x8x128xf32>
    %15 = vector.shape_cast %6 : vector<2x8x128xf32> to vector<2x1x8x128xf32>
    %c0_8 = arith.constant 0 : index
    %c0_9 = arith.constant 0 : index
    %c0_10 = arith.constant 0 : index
    %c0_11 = arith.constant 0 : index
    %16 = vector.load %arg4[%c0_8, %c0_9, %c0_10, %c0_11] : memref<1x2x8x128xf32, #tpu.memory_space<vmem>>, vector<1x2x8x128xf32>
    %17 = vector.shape_cast %16 : vector<1x2x8x128xf32> to vector<2x8x128xf32>
    %18 = arith.mulf %14, %15 : vector<2x1x8x128xf32>
    %cst_12 = arith.constant dense<0.000000e+00> : vector<2x8x128xf32>
    %19 = vector.multi_reduction <add>, %18, %cst_12 [1] : vector<2x1x8x128xf32> to vector<2x8x128xf32>
    %20 = arith.addf %17, %19 : vector<2x8x128xf32>
    %c0_13 = arith.constant 0 : index
    %c0_14 = arith.constant 0 : index
    %c0_15 = arith.constant 0 : index
    %c0_16 = arith.constant 0 : index
    %21 = vector.load %arg4[%c0_13, %c0_14, %c0_15, %c0_16] : memref<1x2x8x128xf32, #tpu.memory_space<vmem>>, vector<1x2x8x128xf32>
    %22 = vector.shape_cast %21 : vector<1x2x8x128xf32> to vector<2x8x128xf32>
    %23 = vector.shape_cast %20 : vector<2x8x128xf32> to vector<1x2x8x128xf32>
    tpu.vector_store %arg4[%c0_13, %c0_14, %c0_15, %c0_16], %23 {strides = array<i32>} : memref<1x2x8x128xf32, #tpu.memory_space<vmem>>, vector<1x2x8x128xf32>,
    %c0_17 = arith.constant 0 : index
    %c0_18 = arith.constant 0 : index
    %c0_19 = arith.constant 0 : index
    %c0_20 = arith.constant 0 : index
    %24 = vector.load %arg5[%c0_17, %c0_18, %c0_19, %c0_20] : memref<1x2x8x128xf32, #tpu.memory_space<vmem>>, vector<1x2x8x128xf32>
    %25 = vector.shape_cast %24 : vector<1x2x8x128xf32> to vector<2x8x128xf32>
    %cst_21 = arith.constant dense<0.000000e+00> : vector<2x8x128xf32>
    %26 = vector.multi_reduction <add>, %14, %cst_21 [1] : vector<2x1x8x128xf32> to vector<2x8x128xf32>
    %27 = arith.addf %25, %26 : vector<2x8x128xf32>
    %c0_22 = arith.constant 0 : index
    %c0_23 = arith.constant 0 : index
    %c0_24 = arith.constant 0 : index
    %c0_25 = arith.constant 0 : index
    %28 = vector.load %arg5[%c0_22, %c0_23, %c0_24, %c0_25] : memref<1x2x8x128xf32, #tpu.memory_space<vmem>>, vector<1x2x8x128xf32>
    %29 = vector.shape_cast %28 : vector<1x2x8x128xf32> to vector<2x8x128xf32>
    %30 = vector.shape_cast %27 : vector<2x8x128xf32> to vector<1x2x8x128xf32>
    tpu.vector_store %arg5[%c0_22, %c0_23, %c0_24, %c0_25], %30 {strides = array<i32>} : memref<1x2x8x128xf32, #tpu.memory_space<vmem>>, vector<1x2x8x128xf32>,
    %c0_26 = arith.constant 0 : index
    %c0_27 = arith.constant 0 : index
    %c0_28 = arith.constant 0 : index
    %c0_29 = arith.constant 0 : index
    %31 = vector.load %arg6[%c0_26, %c0_27, %c0_28, %c0_29] : memref<1x2x8x128xf32, #tpu.memory_space<vmem>>, vector<1x2x8x128xf32>
    %32 = vector.shape_cast %31 : vector<1x2x8x128xf32> to vector<2x8x128xf32>
    %cst_30 = arith.constant dense<0.000000e+00> : vector<2x8x128xf32>
    %33 = vector.multi_reduction <add>, %15, %cst_30 [1] : vector<2x1x8x128xf32> to vector<2x8x128xf32>
    %34 = arith.addf %32, %33 : vector<2x8x128xf32>
    %c0_31 = arith.constant 0 : index
    %c0_32 = arith.constant 0 : index
    %c0_33 = arith.constant 0 : index
    %c0_34 = arith.constant 0 : index
    %35 = vector.load %arg6[%c0_31, %c0_32, %c0_33, %c0_34] : memref<1x2x8x128xf32, #tpu.memory_space<vmem>>, vector<1x2x8x128xf32>
    %36 = vector.shape_cast %35 : vector<1x2x8x128xf32> to vector<2x8x128xf32>
    %37 = vector.shape_cast %34 : vector<2x8x128xf32> to vector<1x2x8x128xf32>
    tpu.vector_store %arg6[%c0_31, %c0_32, %c0_33, %c0_34], %37 {strides = array<i32>} : memref<1x2x8x128xf32, #tpu.memory_space<vmem>>, vector<1x2x8x128xf32>,
    return
  }
  func.func @transform_0(%arg0: i32, %arg1: i32) -> (i32, i32, i32) {
    %c1_i32 = arith.constant 1 : i32
    %0 = arith.muli %arg0, %c1_i32 : i32
    %1 = arith.addi %0, %arg1 : i32
    %c0_i32 = arith.constant 0 : i32
    %c0_i32_0 = arith.constant 0 : i32
    %c0_i32_1 = arith.constant 0 : i32
    return %c0_i32, %1, %c0_i32_0 : i32, i32, i32
  }
  func.func @transform_1(%arg0: i32, %arg1: i32) -> (i32, i32, i32) {
    %c1_i32 = arith.constant 1 : i32
    %0 = arith.muli %arg0, %c1_i32 : i32
    %1 = arith.addi %0, %arg1 : i32
    %c0_i32 = arith.constant 0 : i32
    %c0_i32_0 = arith.constant 0 : i32
    %c0_i32_1 = arith.constant 0 : i32
    return %c0_i32, %1, %c0_i32_0 : i32, i32, i32
  }
  func.func @transform_2(%arg0: i32, %arg1: i32) -> (i32, i32, i32, i32) {
    %c0_i32 = arith.constant 0 : i32
    %c0_i32_0 = arith.constant 0 : i32
    %c0_i32_1 = arith.constant 0 : i32
    %c0_i32_2 = arith.constant 0 : i32
    return %arg0, %c0_i32, %c0_i32_0, %c0_i32_1 : i32, i32, i32, i32
  }
  func.func @transform_3(%arg0: i32, %arg1: i32) -> (i32, i32, i32, i32) {
    %c0_i32 = arith.constant 0 : i32
    %c0_i32_0 = arith.constant 0 : i32
    %c0_i32_1 = arith.constant 0 : i32
    %c0_i32_2 = arith.constant 0 : i32
    return %arg0, %c0_i32, %c0_i32_0, %c0_i32_1 : i32, i32, i32, i32
  }
  func.func @transform_4(%arg0: i32, %arg1: i32) -> (i32, i32, i32, i32) {
    %c0_i32 = arith.constant 0 : i32
    %c0_i32_0 = arith.constant 0 : i32
    %c0_i32_1 = arith.constant 0 : i32
    %c0_i32_2 = arith.constant 0 : i32
    return %arg0, %c0_i32, %c0_i32_0, %c0_i32_1 : i32, i32, i32, i32
  }
}

</mosaic_0001>

<bundles_post_ra>
// kernel: tpu_custom_call.1
= control target key start
LH: loop header
LB: loop body
LE: loop exit
PB: predicated region body
PF: predicated region fallthrough
CT: control target
= control target key end

     0   :  { %10 = vsyncpa [#allocation3], 0  ;;  %s416_s0 = inlined_call_operand.hbm [shape: bf16[2,8,128], index: 0, kind: input, shape index: {}]   ;;  %s417_s1 = inlined_call_operand.hbm [shape: s8[2,8,128], index: 1, kind: input, shape index: {}]   ;;  %s418_s2 = inlined_call_operand.hbm [shape: f32[1,2,8,128], index: 2, kind: output, shape index: {0}]   ;;  %s419_s3 = inlined_call_operand.hbm [shape: f32[1,2,8,128], index: 3, kind: output, shape index: {1}]   ;;  %s420_s4 = inlined_call_operand.hbm [shape: f32[1,2,8,128], index: 4, kind: output, shape index: {2}]  }
   0x1   :  { %11 = vsyncpa [#allocation6], 0 }
   0x2   :  { %12 = vsyncpa [#allocation4], 0 }
   0x3   :  { %13 = vsyncpa [#allocation9], 0  ;;  %s297_s15 = smov [#allocation2]   ;;  %s179_s19 = scalar_lea.hbm %s416_s0, 128 }
   0x4   :  { %s22_s16 = sshll.u32 %s297_s15, 4  ;;  %p180_p0 = scmp.ne.s32.totalorder %s416_s0, %s179_s19  ;;  %s23_s16 = int_to_ptr.vmem [resolvable:$true] %s22_s16 }
   0x5   :  { %p183_p1 = scmp.lt.u32.totalorder %s179_s19, %s416_s0 }
   0x7   :  { %p185_p2 = pnand %p183_p1, %p180_p0 }
   0x9   :  { %188 = shalt.err (!%p185_p2)
}
   0xa   :  { %s189_s24 = scalar_lea.vmem %s23_s16, 128  ;;  %p194_p4 = scmp.lt.s32.totalorder %s23_s16, %s23_s16 }
   0xb   :  { %p190_p3 = scmp.ne.s32.totalorder %s23_s16, %s189_s24  ;;  %p195_p5 = scmp.lt.s32.totalorder %s189_s24, %s189_s24 }
   0xd   :  { %p196_p6 = por %p195_p5, %p194_p4 }
   0xf   :  { %p197_p7 = pnand %p196_p6, %p190_p3 }
  0x11   :  { %200 = shalt.err (!%p197_p7)
}
  0x12   :  { %s298_s25 = smov 64   ;;  %s299_s26 = smov 4  }
  0x13   :  { %28 = dma.hbm_to_vmem [thread:$0]  %s416_s0, 128, %s23_s16, [#allocation3], %s298_s25, %s298_s25, %s299_s26  }
  0x14   :  { %s300_s29 = smov [#allocation5]   ;;  %s201_s7 = scalar_lea.hbm %s417_s1, 64 }
  0x15   :  { %s37_s30 = sshll.u32 %s300_s29, 4  ;;  %p202_p8 = scmp.ne.s32.totalorder %s417_s1, %s201_s7  ;;  %s38_s30 = int_to_ptr.vmem [resolvable:$true] %s37_s30 }
  0x16   :  { %p205_p9 = scmp.lt.u32.totalorder %s201_s7, %s417_s1 }
  0x18   :  { %p207_p10 = pnand %p205_p9, %p202_p8 }
  0x1a   :  { %210 = shalt.err (!%p207_p10)
}
  0x1b   :  { %s211_s12 = scalar_lea.vmem %s38_s30, 64  ;;  %p216_p12 = scmp.lt.s32.totalorder %s38_s30, %s38_s30 }
  0x1c   :  { %p212_p11 = scmp.ne.s32.totalorder %s38_s30, %s211_s12  ;;  %p217_p13 = scmp.lt.s32.totalorder %s211_s12, %s211_s12 }
  0x1e   :  { %p218_p0 = por %p217_p13, %p216_p12 }
  0x20   :  { %p219_p1 = pnand %p218_p0, %p212_p11 }
  0x22   :  { %222 = shalt.err (!%p219_p1)
}
  0x23   :  { %s301_s0 = smov 32   ;;  %s302_s13 = smov 2  }
  0x24   :  { %43 = dma.hbm_to_vmem [thread:$0]  %s417_s1, 64, %s38_s30, [#allocation6], %s301_s0, %s301_s0, %s302_s13  }
  0x25   :  { %289 = dma.done.wait [#allocation3], 128  }
  0x26   :  { %290 = vsyncadd [#allocation3], 4294967168 }
  0x27   :  { %291 = dma.done.wait [#allocation6], 64  }
  0x28   :  { %292 = vsyncadd [#allocation6], 4294967232  ;;  %v156_v0 = vld [vmem:[#allocation2] sm:$0xff]   ;;  %v160_v1 = vld [vmem:[#allocation5] sm:$0xf]   ;;  %s303_s1 = smov [#allocation8]  }
  0x29   :  { %v157_v2 = vunpack.c.l.bf16 %v156_v0  ;;  %v158_v3 = vunpack.c.h.bf16 %v156_v0  ;;  %v161_v4 = vunpack.c.0.s8 %v160_v1  ;;  %v162_v5 = vunpack.c.1.s8 %v160_v1  ;;  %s123_s16 = sshll.u32 %s303_s1, 4  ;;  %s304_s17 = smov [#allocation10]   ;;  %s124_s16 = int_to_ptr.vmem [resolvable:$true] %s123_s16 }
  0x2a   :  { %s135_s18 = sshll.u32 %s304_s17, 4  ;;  %s305_s19 = smov [#allocation7]   ;;  %s357_s18 = int_to_ptr.vmem [resolvable:$true] %s135_s18 }
  0x2b   :  { %v72_v6 = vmul.f32 0.5, %v157_v2  ;;  %v73_v7 = vmul.f32 0.5, %v158_v3  ;;  %v70_v8 = vcvt.s32.f32 %v161_v4  ;;  %v71_v9 = vcvt.s32.f32 %v162_v5  ;;  %s111_s20 = sshll.u32 %s305_s19, 4  ;;  %s223_s21 = scalar_lea.vmem %s124_s16, 256  ;;  %s359_s20 = int_to_ptr.vmem [resolvable:$true] %s111_s20 }
  0x2c   :  { %p224_p2 = scmp.ne.s32.totalorder %s124_s16, %s223_s21  ;;  %p228_p3 = scmp.lt.s32.totalorder %s124_s16, %s124_s16 }
  0x2d   :  { %175 = vtanh.f32 %v72_v6  ;;  %104 = vst [vmem:[#allocation10] sm:$0xff] %v70_v8  ;;  %105 = vst [vmem:[#allocation10 + $0x8] sm:$0xff] %v71_v9  ;;  %p229_p4 = scmp.lt.s32.totalorder %s223_s21, %s223_s21 }
  0x2e   :  { %177 = vtanh.f32 %v73_v7 }
  0x2f   :  { %p230_p5 = por %p229_p4, %p228_p3 }
  0x31   :  { %p231_p6 = pnand %p230_p5, %p224_p2 }
  0x37   :  { %v176_v10 = vpop.eup %175 }
  0x38   :  { %v178_v11 = vpop.eup %177  ;;  %v76_v12 = vadd.f32 1.0, %v176_v10 }
  0x39   :  { %v77_v13 = vadd.f32 1.0, %v178_v11 }
  0x3a   :  { %v78_v14 = vmul.f32 0.5, %v76_v12 }
  0x3b   :  { %v79_v15 = vmul.f32 0.5, %v77_v13 }
  0x3c   :  { %v82_v16 = vmul.f32 %v78_v14, %v70_v8  ;;  %96 = vst [vmem:[#allocation8] sm:$0xff] %v78_v14 }
  0x3d   :  { %v83_v17 = vmul.f32 %v79_v15, %v71_v9  ;;  %97 = vst [vmem:[#allocation8 + $0x8] sm:$0xff] %v79_v15 }
  0x3e   :  { %88 = vst [vmem:[#allocation7] sm:$0xff] %v82_v16 }
  0x3f   :  { %234 = shalt.err (!%p231_p6)
}
  0x40   :  { %s235_s24 = scalar_lea.hbm %s419_s3, 256 }
  0x41   :  { %p236_p7 = scmp.ne.s32.totalorder %s419_s3, %s235_s24  ;;  %p239_p8 = scmp.lt.u32.totalorder %s235_s24, %s419_s3 }
  0x43   :  { %p241_p9 = pnand %p239_p8, %p236_p7 }
  0x45   :  { %244 = shalt.err (!%p241_p9)
}
  0x46   :  { %s306_s29 = smov 128   ;;  %s307_s30 = smov 8   ;;  %89 = vst [vmem:[#allocation7 + $0x8] sm:$0xff] %v83_v17 }
  0x47   :  { %129 = dma.vmem_to_hbm [thread:$0]  %s124_s16, 256, %s419_s3, [#allocation9], %s306_s29, %s306_s29, %s307_s30  }
  0x48   :  { %s245_s7 = scalar_lea.vmem %s357_s18, 256  ;;  %p250_p11 = scmp.lt.s32.totalorder %s357_s18, %s357_s18 }
  0x49   :  { %p246_p10 = scmp.ne.s32.totalorder %s357_s18, %s245_s7  ;;  %p251_p12 = scmp.lt.s32.totalorder %s245_s7, %s245_s7 }
  0x4b   :  { %p252_p13 = por %p251_p12, %p250_p11 }
  0x4d   :  { %p253_p0 = pnand %p252_p13, %p246_p10 }
  0x4f   :  { %256 = shalt.err (!%p253_p0)
}
  0x50   :  { %s257_s10 = scalar_lea.hbm %s420_s4, 256 }
  0x51   :  { %p258_p1 = scmp.ne.s32.totalorder %s420_s4, %s257_s10  ;;  %p261_p2 = scmp.lt.u32.totalorder %s257_s10, %s420_s4 }
  0x53   :  { %p263_p3 = pnand %p261_p2, %p258_p1 }
  0x55   :  { %266 = shalt.err (!%p263_p3)
}
  0x56   :  { %141 = dma.vmem_to_hbm [thread:$0]  %s357_s18, 256, %s420_s4, [#allocation9], %s306_s29, %s306_s29, %s307_s30  }
  0x57   :  { %s267_s15 = scalar_lea.vmem %s359_s20, 256  ;;  %p272_p5 = scmp.lt.s32.totalorder %s359_s20, %s359_s20 }
  0x58   :  { %p268_p4 = scmp.ne.s32.totalorder %s359_s20, %s267_s15  ;;  %p273_p6 = scmp.lt.s32.totalorder %s267_s15, %s267_s15 }
  0x5a   :  { %p274_p7 = por %p273_p6, %p272_p5 }
  0x5c   :  { %p275_p8 = pnand %p274_p7, %p268_p4 }
  0x5e   :  { %278 = shalt.err (!%p275_p8)
}
  0x5f   :  { %s279_s17 = scalar_lea.hbm %s418_s2, 256 }
  0x60   :  { %p280_p9 = scmp.ne.s32.totalorder %s418_s2, %s279_s17  ;;  %p283_p10 = scmp.lt.u32.totalorder %s279_s17, %s418_s2 }
  0x62   :  { %p285_p11 = pnand %p283_p10, %p280_p9 }
  0x64   :  { %288 = shalt.err (!%p285_p11)
}
  0x65   :  { %117 = dma.vmem_to_hbm [thread:$0]  %s359_s20, 256, %s418_s2, [#allocation4], %s306_s29, %s306_s29, %s307_s30  }
  0x66   :  { %293 = dma.done.wait [#allocation4], 256  }
  0x67   :  { %294 = vsyncadd [#allocation4], 4294967040 }
  0x68   :  { %295 = dma.done.wait [#allocation9], 512  }
  0x69   :  { %296 = vsyncadd [#allocation9], 4294966784 }
  0x6a   :  { %151 = vsyncpa [#allocation3], 1 }
  0x6b   :  { %152 = vsyncpa [#allocation6], 1 }
  0x6c   :  { %153 = vsyncpa [#allocation4], 1 }
  0x6d   :  { %154 = vsyncpa [#allocation9], 1 }

</bundles_post_ra>
